<compile_context>
chip_gen: v5e
topology: v5e:2x2
jax: 0.10.0
libtpu: 0.0.40
codegen_flags: <defaults>
</compile_context>

<pallas_src>
import math

import jax
import jax.numpy as jnp
from jax.experimental import pallas as pl
from jax.experimental.pallas import tpu as pltpu


def _cdiv(a, b):
    return -(-a // b)


def _round_up(x, m):
    return _cdiv(x, m) * m


def _fit_tile(dim, max_tile, unit):
    """Choose (tile, padded_dim): tile is a multiple of `unit`, <= ~max_tile,
    and padded_dim = n_blocks * tile >= dim with minimal padding."""
    dim_al = _round_up(dim, unit)
    if dim_al <= max_tile:
        return dim_al, dim_al
    n = _cdiv(dim_al, max_tile)
    tile = _round_up(_cdiv(dim_al, n), unit)
    return tile, n * tile


# ---------------------------------------------------------------------------
# Kernels
# ---------------------------------------------------------------------------
def _dense_kernel_inplace(x_ref, w_ref, b_ref, o_ref):
    # f32 output: accumulate directly into the resident output block.
    # x_ref: [tm, tk], w_ref: [tk, tn], b_ref: [1, tn] (f32), o_ref: [tm, tn] f32.
    k = pl.program_id(2)
    prod = jnp.dot(x_ref[...], w_ref[...], preferred_element_type=jnp.float32)

    @pl.when(k == 0)
    def _():
        # init-with-dot + bias (bias added exactly once).
        o_ref[...] = prod + b_ref[...]

    @pl.when(k > 0)
    def _():
        o_ref[...] += prod


def _dense_kernel_scratch(x_ref, w_ref, b_ref, o_ref, acc_ref):
    # Generic output dtype: f32 VMEM accumulator, cast on the last K step.
    k = pl.program_id(2)
    prod = jnp.dot(x_ref[...], w_ref[...], preferred_element_type=jnp.float32)

    @pl.when(k == 0)
    def _():
        acc_ref[...] = prod

    @pl.when(k > 0)
    def _():
        acc_ref[...] += prod

    @pl.when(k == pl.num_programs(2) - 1)
    def _():
        o_ref[...] = (acc_ref[...] + b_ref[...]).astype(o_ref.dtype)


# ---------------------------------------------------------------------------
# Wrappers
# ---------------------------------------------------------------------------
def prepare_weight(weight):
    """One-time (init) transform of the PyTorch nn.Linear weight:
    (D_out, D_in) -> MXU-native (D_in, D_out)."""
    return jnp.asarray(weight).T


def dense_layer_softmax(x, weight_t, bias, *, max_tm=512, max_tn=512, max_tk=1024):
    """Equivalent of DenseLayerSoftmax.forward (linear only).

    x:        [B, D_in]
    weight_t: [D_in, D_out]  (PyTorch weight pre-transposed once via prepare_weight)
    bias:     [D_out]
    returns   [B, D_out]
    """
    B, D_in = x.shape
    K_w, D_out = weight_t.shape
    assert K_w == D_in, "weight/input dim mismatch"
    out_dtype = x.dtype

    # Sublane packing depends on dtype: f32 -> 8 rows, bf16 -> 16, int8/fp8 -> 32.
    sub = {4: 8, 2: 16, 1: 32}[jnp.dtype(x.dtype).itemsize]

    tm, M = _fit_tile(B, max_tm, sub)
    tn, N = _fit_tile(D_out, max_tn, 128)
    tk, K = _fit_tile(D_in, max_tk, 128)

    # v7x megacore: make sure there are >= 2 blocks along a "parallel" axis
    # (when it costs no extra padding) so the second TensorCore has work.
    if (M // tm) * (N // tn) == 1 and tn % 256 == 0:
        tn //= 2

    # Pad only when needed; exact for matmul + bias. For lane/sublane-aligned
    # production shapes these are no-ops (nothing emitted).
    x_p = x if (M, K) == (B, D_in) else jnp.pad(x, ((0, M - B), (0, K - D_in)))
    w_p = (
        weight_t
        if (K, N) == (D_in, D_out)
        else jnp.pad(weight_t, ((0, K - D_in), (0, N - D_out)))
    )
    b_p = bias.astype(jnp.float32)
    if N != D_out:
        b_p = jnp.pad(b_p, (0, N - D_out))
    b_p = b_p.reshape(1, N)

    grid = (M // tm, N // tn, K // tk)

    use_scratch = out_dtype != jnp.float32
    kernel = _dense_kernel_scratch if use_scratch else _dense_kernel_inplace
    scratch_shapes = [pltpu.VMEM((tm, tn), jnp.float32)] if use_scratch else []

    x_bytes = jnp.dtype(x_p.dtype).itemsize
    w_bytes = jnp.dtype(w_p.dtype).itemsize
    o_bytes = jnp.dtype(out_dtype).itemsize

    cost = pl.CostEstimate(
        flops=2 * M * N * K,
        transcendentals=0,
        bytes_accessed=(
            grid[1] * M * K * x_bytes     # x re-read once per N block
            + grid[0] * K * N * w_bytes   # W re-read once per M block
            + N * 4
            + M * N * o_bytes
        ),
    )

    vmem_est = (
        2 * (tm * tk * x_bytes + tk * tn * w_bytes + tn * 4)  # double-buffered inputs
        + 2 * tm * tn * o_bytes                               # double-buffered output
        + (tm * tn * 4 if use_scratch else 0)
    )
    vmem_limit = min(max(int(vmem_est * 3 // 2), 32 * 1024 * 1024), 128 * 1024 * 1024)

    out = pl.pallas_call(
        kernel,
        out_shape=jax.ShapeDtypeStruct((M, N), out_dtype),
        grid_spec=pltpu.PrefetchScalarGridSpec(
            num_scalar_prefetch=0,
            grid=grid,
            in_specs=[
                pl.BlockSpec((tm, tk), lambda i, j, k: (i, k)),  # x
                pl.BlockSpec((tk, tn), lambda i, j, k: (k, j)),  # W^T (D_in, D_out)
                pl.BlockSpec((1, tn), lambda i, j, k: (0, j)),   # bias
            ],
            out_specs=pl.BlockSpec((tm, tn), lambda i, j, k: (i, j)),
            scratch_shapes=scratch_shapes,
        ),
        compiler_params=pltpu.CompilerParams(
            dimension_semantics=("parallel", "parallel", "arbitrary"),
            vmem_limit_bytes=vmem_limit,
        ),
        cost_estimate=cost,
    )(x_p, w_p, b_p)

    if (M, N) != (B, D_out):
        out = out[:B, :D_out]
    return out


if __name__ == "__main__":
    # Small shapes consistent with the module (nn.Linear(input_dim, output_dim)).
    B, D_in, D_out = 8, 32, 16

    key = jax.random.PRNGKey(0)
    kx, kw, kb = jax.random.split(key, 3)

    # Deterministic init mimicking PyTorch nn.Linear defaults:
    # weight ~ U(-1/sqrt(D_in), 1/sqrt(D_in)), bias likewise.
    bound = 1.0 / math.sqrt(D_in)
    weight = jax.random.uniform(kw, (D_out, D_in), jnp.float32, -bound, bound)
    bias = jax.random.uniform(kb, (D_out,), jnp.float32, -bound, bound)
    x = jax.random.normal(kx, (B, D_in), jnp.float32)

    # One-time parameter prep (init-time weight transpose to MXU layout).
    weight_t = prepare_weight(weight)

    fwd = jax.jit(dense_layer_softmax)
    out = jax.block_until_ready(fwd(x, weight_t, bias))

    # Reference check against plain JAX linear.
    ref = x @ weight.T + bias
    assert out.shape == (B, D_out)
    assert jnp.allclose(out, ref, atol=1e-5, rtol=1e-5)

    # TODO(synk): the module's nn.Softmax member is never used in forward(),
    # so it is intentionally not implemented.

    print("KERNEL_OK")
</pallas_src>

<mosaic_0001>
module attributes {stable_mosaic.version = 11 : i64} {
  func.func @_dense_kernel_inplace(%arg0: i32, %arg1: i32, %arg2: i32, %arg3: memref<8x128xf32, #tpu.memory_space<vmem>>, %arg4: memref<128x128xf32, #tpu.memory_space<vmem>>, %arg5: memref<1x128xf32, #tpu.memory_space<vmem>>, %arg6: memref<8x128xf32, #tpu.memory_space<vmem>>) attributes {dimension_semantics = [#tpu.dimension_semantics<parallel>, #tpu.dimension_semantics<parallel>, #tpu.dimension_semantics<arbitrary>], iteration_bounds = array<i64: 1, 1, 1>, scalar_prefetch = 0 : i64, scratch_operands = 0 : i64, tpu.core_type = #tpu.core_type<tc>, window_params = [{transform_indices = @transform_0, window_bounds = array<i64: 8, 128>}, {transform_indices = @transform_1, window_bounds = array<i64: 128, 128>}, {transform_indices = @transform_2, window_bounds = array<i64: 1, 128>}, {transform_indices = @transform_3, window_bounds = array<i64: 8, 128>}]} {
    %c0 = arith.constant 0 : index
    %c0_0 = arith.constant 0 : index
    %0 = vector.load %arg3[%c0, %c0_0] : memref<8x128xf32, #tpu.memory_space<vmem>>, vector<8x128xf32>
    %c0_1 = arith.constant 0 : index
    %c0_2 = arith.constant 0 : index
    %1 = vector.load %arg4[%c0_1, %c0_2] : memref<128x128xf32, #tpu.memory_space<vmem>>, vector<128x128xf32>
    %cst = arith.constant dense<0.000000e+00> : vector<8x128xf32>
    %2 = tpu.matmul %0, %1, %cst {dimension_numbers = #tpu.dot_dimension_numbers<[1], [0], [0], [1], [0, 0, 1, 1], [], []>} : vector<8x128xf32>, vector<128x128xf32>, vector<8x128xf32> -> vector<8x128xf32>
    %c0_i32 = arith.constant 0 : i32
    %3 = arith.cmpi eq, %arg2, %c0_i32 : i32
    %4 = arith.extui %3 : i1 to i32
    %c0_i32_3 = arith.constant 0 : i32
    %5 = arith.cmpi ne, %4, %c0_i32_3 : i32
    scf.if %5 {
      %c0_6 = arith.constant 0 : index
      %c0_7 = arith.constant 0 : index
      %9 = vector.load %arg5[%c0_6, %c0_7] : memref<1x128xf32, #tpu.memory_space<vmem>>, vector<1x128xf32>
      %10 = vector.broadcast %9 : vector<1x128xf32> to vector<8x128xf32>
      %11 = arith.addf %2, %10 : vector<8x128xf32>
      %c0_8 = arith.constant 0 : index
      %c0_9 = arith.constant 0 : index
      %12 = vector.load %arg6[%c0_8, %c0_9] : memref<8x128xf32, #tpu.memory_space<vmem>>, vector<8x128xf32>
      tpu.vector_store %arg6[%c0_8, %c0_9], %11 {strides = array<i32>} : memref<8x128xf32, #tpu.memory_space<vmem>>, vector<8x128xf32>,
    } else {
    }
    %c0_i32_4 = arith.constant 0 : i32
    %6 = arith.cmpi sgt, %arg2, %c0_i32_4 : i32
    %7 = arith.extui %6 : i1 to i32
    %c0_i32_5 = arith.constant 0 : i32
    %8 = arith.cmpi ne, %7, %c0_i32_5 : i32
    scf.if %8 {
      %c0_6 = arith.constant 0 : index
      %c0_7 = arith.constant 0 : index
      %9 = vector.load %arg6[%c0_6, %c0_7] : memref<8x128xf32, #tpu.memory_space<vmem>>, vector<8x128xf32>
      %10 = arith.addf %9, %2 : vector<8x128xf32>
      %c0_8 = arith.constant 0 : index
      %c0_9 = arith.constant 0 : index
      %11 = vector.load %arg6[%c0_8, %c0_9] : memref<8x128xf32, #tpu.memory_space<vmem>>, vector<8x128xf32>
      tpu.vector_store %arg6[%c0_8, %c0_9], %10 {strides = array<i32>} : memref<8x128xf32, #tpu.memory_space<vmem>>, vector<8x128xf32>,
    } else {
    }
    return
  }
  func.func @transform_0(%arg0: i32, %arg1: i32, %arg2: i32) -> (i32, i32) {
    %c0_i32 = arith.constant 0 : i32
    return %arg0, %arg2 : i32, i32
  }
  func.func @transform_1(%arg0: i32, %arg1: i32, %arg2: i32) -> (i32, i32) {
    %c0_i32 = arith.constant 0 : i32
    return %arg2, %arg1 : i32, i32
  }
  func.func @transform_2(%arg0: i32, %arg1: i32, %arg2: i32) -> (i32, i32) {
    %c0_i32 = arith.constant 0 : i32
    %c0_i32_0 = arith.constant 0 : i32
    return %c0_i32, %arg1 : i32, i32
  }
  func.func @transform_3(%arg0: i32, %arg1: i32, %arg2: i32) -> (i32, i32) {
    %c0_i32 = arith.constant 0 : i32
    return %arg0, %arg1 : i32, i32
  }
}

</mosaic_0001>

<bundles_post_ra>
// kernel: dense_layer_softmax.1
= control target key start
LH: loop header
LB: loop body
LE: loop exit
PB: predicated region body
PF: predicated region fallthrough
CT: control target
= control target key end

     0   :  { %s191_s0 = inlined_call_operand.vmem [shape: f32[8,128], index: 0, kind: input, shape index: {}]   ;;  %s192_s1 = inlined_call_operand.vmem [shape: f32[128,128], index: 1, kind: input, shape index: {}]   ;;  %s193_s2 = inlined_call_operand.vmem [shape: f32[1,128], index: 2, kind: input, shape index: {}]   ;;  %s194_s3 = inlined_call_operand.hbm [shape: f32[8,128], index: 3, kind: output, shape index: {}]  }
   0x1   :  { %v31_v0 = vld [vmem:[%s192_s1 + $0x78] sm:$0xff]  ;;  %v30_v1 = vld [vmem:[%s192_s1 + $0x70] sm:$0xff]  ;;  %v29_v2 = vld [vmem:[%s192_s1 + $0x68] sm:$0xff] }
   0x2   :  { %32 = vmatpush.msra.mxu0 %v31_v0  ;;  %v28_v3 = vld [vmem:[%s192_s1 + $0x60] sm:$0xff]  ;;  %v27_v4 = vld [vmem:[%s192_s1 + $0x58] sm:$0xff] }
   0x4   :  { %33 = vmatpush.msra.mxu0 %v30_v1 }
   0x6   :  { %34 = vmatpush.msra.mxu0 %v29_v2 }
   0x7   :  { %8 = vsyncpa [#allocation3], 0  ;;  %v26_v5 = vld [vmem:[%s192_s1 + $0x50] sm:$0xff]  ;;  %v25_v6 = vld [vmem:[%s192_s1 + $0x48] sm:$0xff]  ;;  %s113_s21 = smov [#allocation2]   ;;  %s76_s25 = sshll.u32 %s194_s3, 4  ;;  %s77_s25 = int_to_ptr.hbm [resolvable:$true] %s76_s25 }
   0x8   :  { %35 = vmatpush.msra.mxu0 %v28_v3  ;;  %v24_v7 = vld [vmem:[%s192_s1 + $0x40] sm:$0xff]  ;;  %v23_v8 = vld [vmem:[%s192_s1 + $0x38] sm:$0xff]  ;;  %v22_v9 = vld [vmem:[%s192_s1 + $0x30] sm:$0xff]  ;;  %s74_s22 = sshll.u32 %s113_s21, 4  ;;  %s75_s22 = int_to_ptr.vmem [resolvable:$true] %s74_s22 }
   0x9   :  { %v21_v10 = vld [vmem:[%s192_s1 + $0x28] sm:$0xff]  ;;  %v20_v11 = vld [vmem:[%s192_s1 + $0x20] sm:$0xff]  ;;  %v19_v12 = vld [vmem:[%s192_s1 + $0x18] sm:$0xff] }
   0xa   :  { %36 = vmatpush.msra.mxu0 %v27_v4  ;;  %v18_v13 = vld [vmem:[%s192_s1 + $0x10] sm:$0xff]  ;;  %v17_v14 = vld [vmem:[%s192_s1 + $0x8] sm:$0xff]  ;;  %v16_v15 = vld [vmem:[%s192_s1] sm:$0xff] }
   0xb   :  { %v15_v16 = vld [vmem:[%s191_s0] sm:$0xff] }
   0xc   :  { %37 = vmatpush.msra.mxu0 %v26_v5  ;;  %v86_v17 = vld [vmem:[%s193_s2] ss:$0 sm:$0xff] }
   0xe   :  { %38 = vmatpush.msra.mxu0 %v25_v6 }
  0x10   :  { %39 = vmatpush.msra.mxu0 %v24_v7 }
  0x12   :  { %40 = vmatpush.msra.mxu0 %v23_v8 }
  0x14   :  { %41 = vmatpush.msra.mxu0 %v22_v9 }
  0x16   :  { %42 = vmatpush.msra.mxu0 %v21_v10 }
  0x18   :  { %43 = vmatpush.msra.mxu0 %v20_v11 }
  0x1a   :  { %44 = vmatpush.msra.mxu0 %v19_v12 }
  0x1c   :  { %45 = vmatpush.msra.mxu0 %v18_v13 }
  0x1e   :  { %46 = vmatpush.msra.mxu0 %v17_v14 }
  0x20   :  { %47 = vmatpush.msra.mxu0 %v16_v15 }
  0x21   :  { %48 = vmatmul.f32.vlgmr.msra.gmra.mxu0 %v15_v16 }
  0x9e   :  { %v49_v18 = vpop.f32.mrf.mxu0 }
  0x9f   :  { %v60_v19 = vadd.f32 %v86_v17, %v49_v18 }
  0xa1   :  { %61 = vst [vmem:[#allocation2] sm:$0xff] %v60_v19 }
  0xa2   :  { %79 = dma.vmem_to_hbm [thread:$0]  %s75_s22, 128, %s77_s25, [#allocation3]  }
  0xa3   :  { %111 = dma.done.wait [#allocation3], 128  }
  0xa4   :  { %112 = vsyncadd [#allocation3], 4294967168 }
  0xa5   :  { %84 = vsyncpa [#allocation3], 1 }

</bundles_post_ra>
